<compile_context>
chip_gen: v5e
topology: v5e:2x2
jax: 0.10.0
libtpu: 0.0.40
codegen_flags: <defaults>
</compile_context>

<pallas_src>
import functools

import jax
import jax.numpy as jnp
from jax.experimental import pallas as pl
from jax.experimental.pallas import tpu as pltpu

_LANE = 128          # lane width / padded hidden & output width
_H1 = 128            # first hidden layer (already lane-dense)


def _round_up(x, m):
    return ((x + m - 1) // m) * m


def _mlp_kernel(x_ref, w1_ref, b1_ref, w2_ref, b2_ref, w3_ref, b3_ref, o_ref):
    # x arrives in its native dtype (f32 from the caller); cast to bf16 on the
    # VPU right before the MXU — free filler while the kernel is HBM-bound.
    x = x_ref[...].astype(jnp.bfloat16)
    # Layer 1: (TB, D) @ (D, 128) + (1, 128), ReLU   (bf16 inputs, f32 acc)
    h1 = jnp.dot(x, w1_ref[...], preferred_element_type=jnp.float32)
    h1 = jnp.maximum(h1 + b1_ref[...], 0.0)
    # Layer 2: (TB, 128) @ (128, 128pad) + (1, 128pad), ReLU
    h2 = jnp.dot(h1.astype(jnp.bfloat16), w2_ref[...],
                 preferred_element_type=jnp.float32)
    h2 = jnp.maximum(h2 + b2_ref[...], 0.0)
    # Dropout(0.3) -> identity in eval mode.
    # TODO(synk): training-mode stochastic dropout not implemented.
    # Layer 3: (TB, 128pad) @ (128pad, 128pad) + (1, 128pad)
    out = jnp.dot(h2.astype(jnp.bfloat16), w3_ref[...],
                  preferred_element_type=jnp.float32)
    o_ref[...] = (out + b3_ref[...]).astype(o_ref.dtype)


@functools.partial(jax.jit, static_argnames=("tile_b",))
def classifier_forward(x, params, *, tile_b=512):
    """x: (B, C, H, W) float32 (or bfloat16).  Returns logits (B, C) float32."""
    w1, b1, w2, b2, w3, b3 = params          # logical (unpadded, f32) shapes
    B = x.shape[0]
    D = w1.shape[0]
    C = w3.shape[1]                          # n_classes

    # ---- flatten only (free reshape of a contiguous array); NO wrapper cast.
    x2d = x.reshape(B, D)
    in_bytes = x2d.dtype.itemsize

    # ---- lane-dense, bf16 weights (zero-pad narrow dims to 128) ------------
    w1p = w1.astype(jnp.bfloat16)                                   # (D, 128)
    b1p = b1.reshape(1, _H1).astype(jnp.float32)                    # (1, 128)
    w2p = jnp.zeros((_H1, _LANE), jnp.bfloat16).at[:, :64].set(
        w2.astype(jnp.bfloat16))                                    # (128, 128)
    b2p = jnp.zeros((1, _LANE), jnp.float32).at[:, :64].set(
        b2.reshape(1, 64))                                          # (1, 128)
    w3p = jnp.zeros((_LANE, _LANE), jnp.bfloat16).at[:64, :C].set(
        w3.astype(jnp.bfloat16))                                    # (128, 128)
    b3p = jnp.zeros((1, _LANE), jnp.float32).at[:, :C].set(
        b3.reshape(1, C))                                           # (1, 128)

    # ---- batch tile: VMEM-budget-driven (28 MiB fits every gen incl. v7x's
    # 64 MiB VMEM), and capped at ceil(B/2) so both v7x TCs get a grid step.
    w_bytes = 2 * (D * _H1 + _H1 * _LANE + _LANE * _LANE) * 2  # dbl-buffered bf16
    b_bytes = 2 * 3 * _LANE * 4                                 # dbl-buffered biases
    per_row = (2 * D * in_bytes        # x tile, double-buffered
               + 2 * _LANE * 2         # bf16 out tile, double-buffered
               + 3 * _LANE * 4)        # f32 intermediates headroom
    budget = (28 << 20) - w_bytes - b_bytes
    tb_budget = max(16, (budget // per_row) // 16 * 16) if budget > 16 * per_row else 16

    tb = min(tile_b, tb_budget)
    tb = min(tb, _round_up(pl.cdiv(B, 2), 16))   # >=2 steps when B allows (v7x megacore)
    tb = min(tb, _round_up(B, 16))               # don't over-pad tiny batches
    tb = max(16, _round_up(tb, 16))              # bf16 sublane packing
    grid_b = pl.cdiv(B, tb)
    b_pad = grid_b * tb
    if b_pad != B:
        # Only triggers for a ragged last tile; padded rows are sliced away.
        x2d = jnp.pad(x2d, ((0, b_pad - B), (0, 0)))

    vmem_needed = w_bytes + b_bytes + tb * per_row + (2 << 20)
    vmem_limit = int(min(max(vmem_needed, 8 << 20), 32 << 20))

    cost = pl.CostEstimate(
        flops=2 * b_pad * (D * _H1 + _H1 * _LANE + _LANE * _LANE),
        transcendentals=0,
        bytes_accessed=(b_pad * D * in_bytes                  # x tiles (native dtype)
                        + (D * _H1 + 2 * _LANE * _LANE) * 2   # bf16 weights
                        + 3 * _LANE * 4                       # f32 biases
                        + b_pad * _LANE * 2),                 # bf16 padded logits out
    )

    const = lambda shape: pl.BlockSpec(shape, lambda i: (0, 0))
    # NOTE: the constant-index weights/biases could additionally be
    # single-buffered (pipeline_mode=pl.Buffered(1)); at these weight sizes
    # the VMEM saving is negligible, so the default buffering is kept.

    out = pl.pallas_call(
        _mlp_kernel,
        out_shape=jax.ShapeDtypeStruct((b_pad, _LANE), jnp.bfloat16),
        grid_spec=pltpu.PrefetchScalarGridSpec(
            num_scalar_prefetch=0,
            grid=(grid_b,),
            in_specs=[
                pl.BlockSpec((tb, D), lambda i: (i, 0)),   # x tile per step
                const(w1p.shape), const(b1p.shape),        # resident weights
                const(w2p.shape), const(b2p.shape),
                const(w3p.shape), const(b3p.shape),
            ],
            out_specs=pl.BlockSpec((tb, _LANE), lambda i: (i, 0)),
        ),
        compiler_params=pltpu.CompilerParams(
            dimension_semantics=("parallel",),
            vmem_limit_bytes=vmem_limit,
        ),
        cost_estimate=cost,
    )(x2d, w1p, b1p, w2p, b2p, w3p, b3p)

    # Layout plumbing: drop batch/lane padding, return f32 logits.
    return out[:B, :C].astype(jnp.float32)


def init_params(key, input_width, n_classes):
    """Deterministic init matching the nn.Linear shapes in __init__."""
    k1, k2, k3, k4, k5, k6 = jax.random.split(key, 6)

    def lin(kw, kb, fan_in, fan_out):
        bound = 1.0 / jnp.sqrt(fan_in)
        w = jax.random.uniform(kw, (fan_in, fan_out), jnp.float32, -bound, bound)
        b = jax.random.uniform(kb, (1, fan_out), jnp.float32, -bound, bound)
        return w, b

    w1, b1 = lin(k1, k2, input_width, 128)
    w2, b2 = lin(k3, k4, 128, 64)
    w3, b3 = lin(k5, k6, 64, n_classes)
    return (w1, b1, w2, b2, w3, b3)


if __name__ == "__main__":
    key = jax.random.PRNGKey(0)
    kx, kp = jax.random.split(key)

    # Small shapes consistent with the module: x = (B=2, C=4, H=16, W=16)
    # -> input_width = 4*16*16 = 1024, n_classes = 8.
    B, Cin, H, W = 2, 4, 16, 16
    input_width = Cin * H * W
    n_classes = 8

    x = jax.random.normal(kx, (B, Cin, H, W), jnp.float32)
    params = init_params(kp, input_width, n_classes)

    logits = classifier_forward(x, params)
    jax.block_until_ready(logits)

    # Reference check in plain JAX (f32 math; kernel uses bf16 matmul inputs
    # with f32 accumulation and bf16 output -> loosened tolerance).
    w1, b1, w2, b2, w3, b3 = params
    xf = x.reshape(B, -1)
    ref = jnp.maximum(xf @ w1 + b1, 0.0)
    ref = jnp.maximum(ref @ w2 + b2, 0.0)
    ref = ref @ w3 + b3

    assert logits.shape == (B, n_classes)
    assert jnp.allclose(logits, ref, atol=3e-2, rtol=3e-2), (
        float(jnp.max(jnp.abs(logits - ref))))

    print("KERNEL_OK")
</pallas_src>

<mosaic_0001>
module attributes {stable_mosaic.version = 11 : i64} {
  func.func @_mlp_kernel(%arg0: i32, %arg1: memref<16x1024xf32, #tpu.memory_space<vmem>>, %arg2: memref<1024x128xbf16, #tpu.memory_space<vmem>>, %arg3: memref<1x128xf32, #tpu.memory_space<vmem>>, %arg4: memref<128x128xbf16, #tpu.memory_space<vmem>>, %arg5: memref<1x128xf32, #tpu.memory_space<vmem>>, %arg6: memref<128x128xbf16, #tpu.memory_space<vmem>>, %arg7: memref<1x128xf32, #tpu.memory_space<vmem>>, %arg8: memref<16x128xbf16, #tpu.memory_space<vmem>>) attributes {dimension_semantics = [#tpu.dimension_semantics<parallel>], iteration_bounds = array<i64: 1>, scalar_prefetch = 0 : i64, scratch_operands = 0 : i64, tpu.core_type = #tpu.core_type<tc>, window_params = [{transform_indices = @transform_0, window_bounds = array<i64: 16, 1024>}, {pipeline_mode = #tpu.pipeline_mode<synchronous>, transform_indices = @transform_1, window_bounds = array<i64: 1024, 128>}, {pipeline_mode = #tpu.pipeline_mode<synchronous>, transform_indices = @transform_2, window_bounds = array<i64: 1, 128>}, {pipeline_mode = #tpu.pipeline_mode<synchronous>, transform_indices = @transform_3, window_bounds = array<i64: 128, 128>}, {pipeline_mode = #tpu.pipeline_mode<synchronous>, transform_indices = @transform_4, window_bounds = array<i64: 1, 128>}, {pipeline_mode = #tpu.pipeline_mode<synchronous>, transform_indices = @transform_5, window_bounds = array<i64: 128, 128>}, {pipeline_mode = #tpu.pipeline_mode<synchronous>, transform_indices = @transform_6, window_bounds = array<i64: 1, 128>}, {transform_indices = @transform_7, window_bounds = array<i64: 16, 128>}]} {
    %c0 = arith.constant 0 : index
    %c0_0 = arith.constant 0 : index
    %0 = vector.load %arg1[%c0, %c0_0] : memref<16x1024xf32, #tpu.memory_space<vmem>>, vector<16x1024xf32>
    %1 = arith.truncf %0 : vector<16x1024xf32> to vector<16x1024xbf16>
    %c0_1 = arith.constant 0 : index
    %c0_2 = arith.constant 0 : index
    %2 = vector.load %arg2[%c0_1, %c0_2] : memref<1024x128xbf16, #tpu.memory_space<vmem>>, vector<1024x128xbf16>
    %cst = arith.constant dense<0.000000e+00> : vector<16x128xf32>
    %3 = tpu.matmul %1, %2, %cst {dimension_numbers = #tpu.dot_dimension_numbers<[1], [0], [0], [1], [0, 0, 1, 1], [], []>} : vector<16x1024xbf16>, vector<1024x128xbf16>, vector<16x128xf32> -> vector<16x128xf32>
    %c0_3 = arith.constant 0 : index
    %c0_4 = arith.constant 0 : index
    %4 = vector.load %arg3[%c0_3, %c0_4] : memref<1x128xf32, #tpu.memory_space<vmem>>, vector<1x128xf32>
    %5 = vector.broadcast %4 : vector<1x128xf32> to vector<16x128xf32>
    %6 = arith.addf %3, %5 : vector<16x128xf32>
    %cst_5 = arith.constant 0.000000e+00 : f32
    %7 = vector.broadcast %cst_5 : f32 to vector<16x128xf32>
    %8 = arith.maximumf %6, %7 : vector<16x128xf32>
    %9 = arith.truncf %8 : vector<16x128xf32> to vector<16x128xbf16>
    %c0_6 = arith.constant 0 : index
    %c0_7 = arith.constant 0 : index
    %10 = vector.load %arg4[%c0_6, %c0_7] : memref<128x128xbf16, #tpu.memory_space<vmem>>, vector<128x128xbf16>
    %cst_8 = arith.constant dense<0.000000e+00> : vector<16x128xf32>
    %11 = tpu.matmul %9, %10, %cst_8 {dimension_numbers = #tpu.dot_dimension_numbers<[1], [0], [0], [1], [0, 0, 1, 1], [], []>} : vector<16x128xbf16>, vector<128x128xbf16>, vector<16x128xf32> -> vector<16x128xf32>
    %c0_9 = arith.constant 0 : index
    %c0_10 = arith.constant 0 : index
    %12 = vector.load %arg5[%c0_9, %c0_10] : memref<1x128xf32, #tpu.memory_space<vmem>>, vector<1x128xf32>
    %13 = vector.broadcast %12 : vector<1x128xf32> to vector<16x128xf32>
    %14 = arith.addf %11, %13 : vector<16x128xf32>
    %cst_11 = arith.constant 0.000000e+00 : f32
    %15 = vector.broadcast %cst_11 : f32 to vector<16x128xf32>
    %16 = arith.maximumf %14, %15 : vector<16x128xf32>
    %17 = arith.truncf %16 : vector<16x128xf32> to vector<16x128xbf16>
    %c0_12 = arith.constant 0 : index
    %c0_13 = arith.constant 0 : index
    %18 = vector.load %arg6[%c0_12, %c0_13] : memref<128x128xbf16, #tpu.memory_space<vmem>>, vector<128x128xbf16>
    %cst_14 = arith.constant dense<0.000000e+00> : vector<16x128xf32>
    %19 = tpu.matmul %17, %18, %cst_14 {dimension_numbers = #tpu.dot_dimension_numbers<[1], [0], [0], [1], [0, 0, 1, 1], [], []>} : vector<16x128xbf16>, vector<128x128xbf16>, vector<16x128xf32> -> vector<16x128xf32>
    %c0_15 = arith.constant 0 : index
    %c0_16 = arith.constant 0 : index
    %20 = vector.load %arg7[%c0_15, %c0_16] : memref<1x128xf32, #tpu.memory_space<vmem>>, vector<1x128xf32>
    %21 = vector.broadcast %20 : vector<1x128xf32> to vector<16x128xf32>
    %22 = arith.addf %19, %21 : vector<16x128xf32>
    %23 = arith.truncf %22 : vector<16x128xf32> to vector<16x128xbf16>
    %c0_17 = arith.constant 0 : index
    %c0_18 = arith.constant 0 : index
    %24 = vector.load %arg8[%c0_17, %c0_18] : memref<16x128xbf16, #tpu.memory_space<vmem>>, vector<16x128xbf16>
    tpu.vector_store %arg8[%c0_17, %c0_18], %23 {strides = array<i32>} : memref<16x128xbf16, #tpu.memory_space<vmem>>, vector<16x128xbf16>,
    return
  }
  func.func @transform_0(%arg0: i32) -> (i32, i32) {
    %c0_i32 = arith.constant 0 : i32
    %c0_i32_0 = arith.constant 0 : i32
    return %arg0, %c0_i32 : i32, i32
  }
  func.func @transform_1(%arg0: i32) -> (i32, i32) {
    %c0_i32 = arith.constant 0 : i32
    %c0_i32_0 = arith.constant 0 : i32
    %c0_i32_1 = arith.constant 0 : i32
    return %c0_i32, %c0_i32_0 : i32, i32
  }
  func.func @transform_2(%arg0: i32) -> (i32, i32) {
    %c0_i32 = arith.constant 0 : i32
    %c0_i32_0 = arith.constant 0 : i32
    %c0_i32_1 = arith.constant 0 : i32
    return %c0_i32, %c0_i32_0 : i32, i32
  }
  func.func @transform_3(%arg0: i32) -> (i32, i32) {
    %c0_i32 = arith.constant 0 : i32
    %c0_i32_0 = arith.constant 0 : i32
    %c0_i32_1 = arith.constant 0 : i32
    return %c0_i32, %c0_i32_0 : i32, i32
  }
  func.func @transform_4(%arg0: i32) -> (i32, i32) {
    %c0_i32 = arith.constant 0 : i32
    %c0_i32_0 = arith.constant 0 : i32
    %c0_i32_1 = arith.constant 0 : i32
    return %c0_i32, %c0_i32_0 : i32, i32
  }
  func.func @transform_5(%arg0: i32) -> (i32, i32) {
    %c0_i32 = arith.constant 0 : i32
    %c0_i32_0 = arith.constant 0 : i32
    %c0_i32_1 = arith.constant 0 : i32
    return %c0_i32, %c0_i32_0 : i32, i32
  }
  func.func @transform_6(%arg0: i32) -> (i32, i32) {
    %c0_i32 = arith.constant 0 : i32
    %c0_i32_0 = arith.constant 0 : i32
    %c0_i32_1 = arith.constant 0 : i32
    return %c0_i32, %c0_i32_0 : i32, i32
  }
  func.func @transform_7(%arg0: i32) -> (i32, i32) {
    %c0_i32 = arith.constant 0 : i32
    %c0_i32_0 = arith.constant 0 : i32
    return %arg0, %c0_i32 : i32, i32
  }
}

</mosaic_0001>

<bundles_post_ra>
// kernel: classifier_forward.1
= control target key start
LH: loop header
LB: loop body
LE: loop exit
PB: predicated region body
PF: predicated region fallthrough
CT: control target
= control target key end

     0   :  { %s1604_s1 = inlined_call_operand.vmem [shape: bf16[1024,128], index: 1, kind: input, shape index: {}]   ;;  %s1605_s2 = inlined_call_operand.vmem [shape: f32[1,128], index: 2, kind: input, shape index: {}]   ;;  %s1606_s0 = inlined_call_operand.vmem [shape: f32[16,1024], index: 0, kind: input, shape index: {}]   ;;  %s1607_s4 = inlined_call_operand.vmem [shape: f32[1,128], index: 4, kind: input, shape index: {}]   ;;  %s1608_s3 = inlined_call_operand.vmem [shape: bf16[128,128], index: 3, kind: input, shape index: {}]   ;;  %s1609_s5 = inlined_call_operand.vmem [shape: bf16[128,128], index: 5, kind: input, shape index: {}]   ;;  %s1610_s6 = inlined_call_operand.vmem [shape: f32[1,128], index: 6, kind: input, shape index: {}]   ;;  %s1611_s7 = inlined_call_operand.vmem [shape: bf16[16,128], index: 7, kind: output, shape index: {}]  }
   0x1   :  { %v1183_v0 = vld [vmem:[%s1604_s1 + $0x38] sm:$0xff]  ;;  %v1182_v4 = vld [vmem:[%s1604_s1 + $0x30] sm:$0xff]  ;;  %v1181_v8 = vld [vmem:[%s1604_s1 + $0x28] sm:$0xff] }
   0x2   :  { %v1191_v1 = vld [vmem:[%s1604_s1 + $0x78] sm:$0xff]  ;;  %566 = vmatpush.bf16.msra.mxu0 %v1183_v0  ;;  %v1190_v5 = vld [vmem:[%s1604_s1 + $0x70] sm:$0xff]  ;;  %v1189_v9 = vld [vmem:[%s1604_s1 + $0x68] sm:$0xff] }
   0x3   :  { %v1199_v2 = vld [vmem:[%s1604_s1 + $0xb8] sm:$0xff]  ;;  %580 = vmatpush.bf16.msra.mxu1 %v1191_v1  ;;  %v1198_v6 = vld [vmem:[%s1604_s1 + $0xb0] sm:$0xff]  ;;  %v1197_v10 = vld [vmem:[%s1604_s1 + $0xa8] sm:$0xff] }
   0x4   :  { %v1207_v3 = vld [vmem:[%s1604_s1 + $0xf8] sm:$0xff]  ;;  %594 = vmatpush.bf16.msra.mxu2 %v1199_v2  ;;  %v1206_v7 = vld [vmem:[%s1604_s1 + $0xf0] sm:$0xff]  ;;  %v1205_v11 = vld [vmem:[%s1604_s1 + $0xe8] sm:$0xff] }
   0x5   :  { %608 = vmatpush.bf16.msra.mxu3 %v1207_v3  ;;  %v1180_v12 = vld [vmem:[%s1604_s1 + $0x20] sm:$0xff]  ;;  %v1179_v16 = vld [vmem:[%s1604_s1 + $0x18] sm:$0xff]  ;;  %v1178_v20 = vld [vmem:[%s1604_s1 + $0x10] sm:$0xff] }
   0x6   :  { %567 = vmatpush.bf16.msra.mxu0 %v1182_v4  ;;  %v1188_v13 = vld [vmem:[%s1604_s1 + $0x60] sm:$0xff]  ;;  %v1187_v17 = vld [vmem:[%s1604_s1 + $0x58] sm:$0xff]  ;;  %v1186_v21 = vld [vmem:[%s1604_s1 + $0x50] sm:$0xff] }
   0x7   :  { %581 = vmatpush.bf16.msra.mxu1 %v1190_v5  ;;  %v1196_v14 = vld [vmem:[%s1604_s1 + $0xa0] sm:$0xff]  ;;  %v1195_v18 = vld [vmem:[%s1604_s1 + $0x98] sm:$0xff]  ;;  %v1194_v22 = vld [vmem:[%s1604_s1 + $0x90] sm:$0xff] }
   0x8   :  { %595 = vmatpush.bf16.msra.mxu2 %v1198_v6  ;;  %v1204_v15 = vld [vmem:[%s1604_s1 + $0xe0] sm:$0xff]  ;;  %v1203_v19 = vld [vmem:[%s1604_s1 + $0xd8] sm:$0xff]  ;;  %v1202_v23 = vld [vmem:[%s1604_s1 + $0xd0] sm:$0xff] }
   0x9   :  { %609 = vmatpush.bf16.msra.mxu3 %v1206_v7  ;;  %v1177_v24 = vld [vmem:[%s1604_s1 + $0x8] sm:$0xff]  ;;  %v1176_v28 = vld [vmem:[%s1604_s1] sm:$0xff]  ;;  %v1215_v32 = vld [vmem:[%s1604_s1 + $0x138] sm:$0xff] }
   0xa   :  { %568 = vmatpush.bf16.msra.mxu0 %v1181_v8  ;;  %v1185_v25 = vld [vmem:[%s1604_s1 + $0x48] sm:$0xff]  ;;  %v1184_v29 = vld [vmem:[%s1604_s1 + $0x40] sm:$0xff]  ;;  %v1223_v33 = vld [vmem:[%s1604_s1 + $0x178] sm:$0xff] }
   0xb   :  { %582 = vmatpush.bf16.msra.mxu1 %v1189_v9  ;;  %v1193_v26 = vld [vmem:[%s1604_s1 + $0x88] sm:$0xff]  ;;  %v1192_v30 = vld [vmem:[%s1604_s1 + $0x80] sm:$0xff]  ;;  %v28_v34 = vld [vmem:[%s1606_s0 + $0x10] sm:$0xff] }
   0xc   :  { %596 = vmatpush.bf16.msra.mxu2 %v1197_v10  ;;  %v1201_v27 = vld [vmem:[%s1604_s1 + $0xc8] sm:$0xff]  ;;  %v1200_v31 = vld [vmem:[%s1604_s1 + $0xc0] sm:$0xff]  ;;  %v36_v35 = vld [vmem:[%s1606_s0 + $0x50] sm:$0xff] }
   0xd   :  { %610 = vmatpush.bf16.msra.mxu3 %v1205_v11  ;;  %v26_v36 = vld [vmem:[%s1606_s0] sm:$0xff]  ;;  %v29_v38 = vld [vmem:[%s1606_s0 + $0x18] sm:$0xff]  ;;  %v27_v40 = vld [vmem:[%s1606_s0 + $0x8] sm:$0xff]  ;;  %v44_v44 = vpack.c.bf16 %v36_v35, %v28_v34 }
   0xe   :  { %569 = vmatpush.bf16.msra.mxu0 %v1180_v12  ;;  %v34_v37 = vld [vmem:[%s1606_s0 + $0x40] sm:$0xff]  ;;  %v37_v39 = vld [vmem:[%s1606_s0 + $0x58] sm:$0xff]  ;;  %v35_v41 = vld [vmem:[%s1606_s0 + $0x48] sm:$0xff] }
   0xf   :  { %583 = vmatpush.bf16.msra.mxu1 %v1188_v13  ;;  %v1231_v42 = vld [vmem:[%s1604_s1 + $0x1b8] sm:$0xff]  ;;  %v42_v45 = vpack.c.bf16 %v34_v37, %v26_v36  ;;  %v45_v46 = vpack.c.bf16 %v37_v39, %v29_v38  ;;  %v43_v47 = vpack.c.bf16 %v35_v41, %v27_v40  ;;  %v1214_v48 = vld [vmem:[%s1604_s1 + $0x130] sm:$0xff]  ;;  %v1213_v52 = vld [vmem:[%s1604_s1 + $0x128] sm:$0xff] }
  0x10   :  { %597 = vmatpush.bf16.msra.mxu2 %v1196_v14  ;;  %v1239_v43 = vld [vmem:[%s1604_s1 + $0x1f8] sm:$0xff]  ;;  %v1222_v49 = vld [vmem:[%s1604_s1 + $0x170] sm:$0xff]  ;;  %v1221_v53 = vld [vmem:[%s1604_s1 + $0x168] sm:$0xff] }
  0x11   :  { %611 = vmatpush.bf16.msra.mxu3 %v1204_v15  ;;  %v1230_v50 = vld [vmem:[%s1604_s1 + $0x1b0] sm:$0xff]  ;;  %v1229_v54 = vld [vmem:[%s1604_s1 + $0x1a8] sm:$0xff]  ;;  %v1212_v56 = vld [vmem:[%s1604_s1 + $0x120] sm:$0xff] }
  0x12   :  { %570 = vmatpush.bf16.msra.mxu0 %v1179_v16  ;;  %v1238_v51 = vld [vmem:[%s1604_s1 + $0x1f0] sm:$0xff]  ;;  %v1237_v55 = vld [vmem:[%s1604_s1 + $0x1e8] sm:$0xff]  ;;  %v1220_v57 = vld [vmem:[%s1604_s1 + $0x160] sm:$0xff] }
  0x13   :  { %584 = vmatpush.bf16.msra.mxu1 %v1187_v17  ;;  %v1228_v58 = vld [vmem:[%s1604_s1 + $0x1a0] sm:$0xff]  ;;  %v1211_v60 = vld [vmem:[%s1604_s1 + $0x118] sm:$0xff]  ;;  %v1210_v0 = vld [vmem:[%s1604_s1 + $0x110] sm:$0xff] }
  0x14   :  { %598 = vmatpush.bf16.msra.mxu2 %v1195_v18  ;;  %v1236_v59 = vld [vmem:[%s1604_s1 + $0x1e0] sm:$0xff]  ;;  %v1219_v61 = vld [vmem:[%s1604_s1 + $0x158] sm:$0xff]  ;;  %v1218_v1 = vld [vmem:[%s1604_s1 + $0x150] sm:$0xff] }
  0x15   :  { %612 = vmatpush.bf16.msra.mxu3 %v1203_v19  ;;  %v1227_v62 = vld [vmem:[%s1604_s1 + $0x198] sm:$0xff]  ;;  %v1226_v2 = vld [vmem:[%s1604_s1 + $0x190] sm:$0xff]  ;;  %v1209_v4 = vld [vmem:[%s1604_s1 + $0x108] sm:$0xff] }
  0x16   :  { %571 = vmatpush.bf16.msra.mxu0 %v1178_v20  ;;  %v1235_v63 = vld [vmem:[%s1604_s1 + $0x1d8] sm:$0xff]  ;;  %v1234_v3 = vld [vmem:[%s1604_s1 + $0x1d0] sm:$0xff]  ;;  %v1217_v5 = vld [vmem:[%s1604_s1 + $0x148] sm:$0xff] }
  0x17   :  { %585 = vmatpush.bf16.msra.mxu1 %v1186_v21  ;;  %v1225_v6 = vld [vmem:[%s1604_s1 + $0x188] sm:$0xff]  ;;  %v1208_v8 = vld [vmem:[%s1604_s1 + $0x100] sm:$0xff]  ;;  %v32_v16 = vld [vmem:[%s1606_s0 + $0x30] sm:$0xff] }
  0x18   :  { %599 = vmatpush.bf16.msra.mxu2 %v1194_v22  ;;  %v1233_v7 = vld [vmem:[%s1604_s1 + $0x1c8] sm:$0xff]  ;;  %v1216_v9 = vld [vmem:[%s1604_s1 + $0x140] sm:$0xff]  ;;  %v40_v17 = vld [vmem:[%s1606_s0 + $0x70] sm:$0xff] }
  0x19   :  { %613 = vmatpush.bf16.msra.mxu3 %v1202_v23  ;;  %v1224_v10 = vld [vmem:[%s1604_s1 + $0x180] sm:$0xff]  ;;  %v31_v14 = vld [vmem:[%s1606_s0 + $0x28] sm:$0xff]  ;;  %v33_v18 = vld [vmem:[%s1606_s0 + $0x38] sm:$0xff]  ;;  %v48_v22 = vpack.c.bf16 %v40_v17, %v32_v16 }
  0x1a   :  { %572 = vmatpush.bf16.msra.mxu0 %v1177_v24  ;;  %v1232_v11 = vld [vmem:[%s1604_s1 + $0x1c0] sm:$0xff]  ;;  %v39_v15 = vld [vmem:[%s1606_s0 + $0x68] sm:$0xff]  ;;  %v41_v19 = vld [vmem:[%s1606_s0 + $0x78] sm:$0xff] }
  0x1b   :  { %586 = vmatpush.bf16.msra.mxu1 %v1185_v25  ;;  %v30_v12 = vld [vmem:[%s1606_s0 + $0x20] sm:$0xff]  ;;  %v47_v21 = vpack.c.bf16 %v39_v15, %v31_v14  ;;  %v49_v23 = vpack.c.bf16 %v41_v19, %v33_v18  ;;  %v1247_v24 = vld [vmem:[%s1608_s3 + $0x38] sm:$0xff]  ;;  %v1246_v25 = vld [vmem:[%s1608_s3 + $0x30] sm:$0xff] }
  0x1c   :  { %600 = vmatpush.bf16.msra.mxu2 %v1193_v26  ;;  %v38_v13 = vld [vmem:[%s1606_s0 + $0x60] sm:$0xff]  ;;  %v1245_v26 = vld [vmem:[%s1608_s3 + $0x28] sm:$0xff]  ;;  %v1255_v39 = vld [vmem:[%s1609_s5 + $0x38] sm:$0xff] }
  0x1d   :  { %614 = vmatpush.bf16.msra.mxu3 %v1201_v27  ;;  %v46_v20 = vpack.c.bf16 %v38_v13, %v30_v12  ;;  %v1244_v27 = vld [vmem:[%s1608_s3 + $0x20] sm:$0xff]  ;;  %v1254_v40 = vld [vmem:[%s1609_s5 + $0x30] sm:$0xff] }
  0x1e   :  { %573 = vmatpush.bf16.msra.mxu0 %v1176_v28  ;;  %v1243_v28 = vld [vmem:[%s1608_s3 + $0x18] sm:$0xff]  ;;  %v1261_v34 = vld [vmem:[%s1605_s2] ss:$0 sm:$0xff] }
  0x1f   :  { %587 = vmatpush.bf16.msra.mxu1 %v1184_v29  ;;  %v1242_v29 = vld [vmem:[%s1608_s3 + $0x10] sm:$0xff]  ;;  %v1262_v13 = vld [vmem:[%s1607_s4] ss:$0 sm:$0xff] }
  0x20   :  { %601 = vmatpush.bf16.msra.mxu2 %v1192_v30 }
  0x21   :  { %615 = vmatpush.bf16.msra.mxu3 %v1200_v31  ;;  %574 = vmatmul.bf16.vlgmr.msra.gmra.mxu0 %v42_v45  ;;  %v1241_v31 = vld [vmem:[%s1608_s3 + $0x8] sm:$0xff] }
  0x22   :  { %622 = vmatpush.bf16.msrb.mxu0 %v1215_v32  ;;  %588 = vmatmul.bf16.vlgmr.msra.gmra.mxu1 %v43_v47 }
  0x23   :  { %636 = vmatpush.bf16.msrb.mxu1 %v1223_v33  ;;  %602 = vmatmul.bf16.vlgmr.msra.gmra.mxu2 %v44_v44  ;;  %v1240_v33 = vld [vmem:[%s1608_s3] sm:$0xff]  ;;  %v1253_v44 = vld [vmem:[%s1609_s5 + $0x28] sm:$0xff] }
  0x24   :  { %650 = vmatpush.bf16.msrb.mxu2 %v1231_v42  ;;  %616 = vmatmul.bf16.vlgmr.msra.gmra.mxu3 %v45_v46 }
  0x25   :  { %664 = vmatpush.bf16.msrb.mxu3 %v1239_v43 }
  0x26   :  { %623 = vmatpush.bf16.msrb.mxu0 %v1214_v48 }
  0x27   :  { %637 = vmatpush.bf16.msrb.mxu1 %v1222_v49 }
  0x28   :  { %651 = vmatpush.bf16.msrb.mxu2 %v1230_v50  ;;  %v1252_v50 = vld [vmem:[%s1609_s5 + $0x20] sm:$0xff] }
  0x29   :  { %665 = vmatpush.bf16.msrb.mxu3 %v1238_v51 }
  0x2a   :  { %624 = vmatpush.bf16.msrb.mxu0 %v1213_v52 }
  0x2b   :  { %638 = vmatpush.bf16.msrb.mxu1 %v1221_v53 }
  0x2c   :  { %652 = vmatpush.bf16.msrb.mxu2 %v1229_v54 }
  0x2d   :  { %666 = vmatpush.bf16.msrb.mxu3 %v1237_v55 }
  0x2e   :  { %625 = vmatpush.bf16.msrb.mxu0 %v1212_v56 }
  0x2f   :  { %639 = vmatpush.bf16.msrb.mxu1 %v1220_v57 }
  0x30   :  { %653 = vmatpush.bf16.msrb.mxu2 %v1228_v58 }
  0x31   :  { %667 = vmatpush.bf16.msrb.mxu3 %v1236_v59 }
  0x32   :  { %626 = vmatpush.bf16.msrb.mxu0 %v1211_v60 }
  0x33   :  { %640 = vmatpush.bf16.msrb.mxu1 %v1219_v61 }
  0x34   :  { %654 = vmatpush.bf16.msrb.mxu2 %v1227_v62 }
  0x35   :  { %668 = vmatpush.bf16.msrb.mxu3 %v1235_v63 }
  0x36   :  { %627 = vmatpush.bf16.msrb.mxu0 %v1210_v0 }
  0x37   :  { %641 = vmatpush.bf16.msrb.mxu1 %v1218_v1 }
  0x38   :  { %655 = vmatpush.bf16.msrb.mxu2 %v1226_v2 }
  0x39   :  { %669 = vmatpush.bf16.msrb.mxu3 %v1234_v3 }
  0x3a   :  { %628 = vmatpush.bf16.msrb.mxu0 %v1209_v4 }
  0x3b   :  { %642 = vmatpush.bf16.msrb.mxu1 %v1217_v5 }
  0x3c   :  { %656 = vmatpush.bf16.msrb.mxu2 %v1225_v6 }
  0x3d   :  { %670 = vmatpush.bf16.msrb.mxu3 %v1233_v7 }
  0x3e   :  { %629 = vmatpush.bf16.msrb.mxu0 %v1208_v8  ;;  %v1251_v8 = vld [vmem:[%s1609_s5 + $0x18] sm:$0xff] }
  0x3f   :  { %643 = vmatpush.bf16.msrb.mxu1 %v1216_v9  ;;  %v1250_v9 = vld [vmem:[%s1609_s5 + $0x10] sm:$0xff] }
  0x40   :  { %657 = vmatpush.bf16.msrb.mxu2 %v1224_v10  ;;  %v1249_v10 = vld [vmem:[%s1609_s5 + $0x8] sm:$0xff] }
  0x41   :  { %671 = vmatpush.bf16.msrb.mxu3 %v1232_v11  ;;  %630 = vmatmul.bf16.vlgmr.msrb.gmra.mxu0 %v46_v20  ;;  %v1248_v11 = vld [vmem:[%s1609_s5] sm:$0xff] }
  0x42   :  { %644 = vmatmul.bf16.vlgmr.msrb.gmra.mxu1 %v47_v21  ;;  %749 = vmatpush.bf16.msra.mxu0 %v1247_v24  ;;  %v1263_v21 = vld [vmem:[%s1610_s6] ss:$0 sm:$0xff] }
  0x43   :  { %658 = vmatmul.bf16.vlgmr.msrb.gmra.mxu2 %v48_v22  ;;  %834 = vmatpush.bf16.msra.mxu1 %v1255_v39 }
  0x44   :  { %672 = vmatmul.bf16.vlgmr.msrb.gmra.mxu3 %v49_v23 }
  0x46   :  { %750 = vmatpush.bf16.msra.mxu0 %v1246_v25 }
  0x47   :  { %835 = vmatpush.bf16.msra.mxu1 %v1254_v40 }
  0x4a   :  { %751 = vmatpush.bf16.msra.mxu0 %v1245_v26 }
  0x4b   :  { %836 = vmatpush.bf16.msra.mxu1 %v1253_v44 }
  0x4e   :  { %752 = vmatpush.bf16.msra.mxu0 %v1244_v27 }
  0x4f   :  { %837 = vmatpush.bf16.msra.mxu1 %v1252_v50 }
  0x52   :  { %753 = vmatpush.bf16.msra.mxu0 %v1243_v28 }
  0x53   :  { %838 = vmatpush.bf16.msra.mxu1 %v1251_v8 }
  0x56   :  { %754 = vmatpush.bf16.msra.mxu0 %v1242_v29 }
  0x57   :  { %839 = vmatpush.bf16.msra.mxu1 %v1250_v9 }
  0x5a   :  { %755 = vmatpush.bf16.msra.mxu0 %v1241_v31 }
  0x5b   :  { %840 = vmatpush.bf16.msra.mxu1 %v1249_v10 }
  0x5e   :  { %756 = vmatpush.bf16.msra.mxu0 %v1240_v33 }
  0x5f   :  { %841 = vmatpush.bf16.msra.mxu1 %v1248_v11 }
  0x9e   :  { %v575_v30 = vpop.f32.mrf.mxu0 }
  0x9f   :  { %v589_v32 = vpop.f32.mrf.mxu1  ;;  %v576_v37 = vadd.f32 %v1261_v34, %v575_v30 }
  0xa1   :  { %v590_v42 = vadd.f32 %v589_v32, %v576_v37 }
  0xa6   :  { %v603_v35 = vpop.f32.mrf.mxu2  ;;  %v577_v38 = vpop.f32.mrf.mxu0 }
  0xa7   :  { %v617_v36 = vpop.f32.mrf.mxu3  ;;  %v591_v41 = vpop.f32.mrf.mxu1  ;;  %v578_v43 = vadd.f32 %v1261_v34, %v577_v38  ;;  %v604_v47 = vadd.f32 %v603_v35, %v590_v42 }
  0xa9   :  { %v592_v48 = vadd.f32 %v591_v41, %v578_v43  ;;  %v618_v52 = vadd.f32 %v617_v36, %v604_v47 }
  0xae   :  { %v605_v45 = vpop.f32.mrf.mxu2 }
  0xaf   :  { %v619_v46 = vpop.f32.mrf.mxu3  ;;  %v606_v53 = vadd.f32 %v605_v45, %v592_v48 }
  0xb1   :  { %v620_v57 = vadd.f32 %v619_v46, %v606_v53 }
  0xbe   :  { %v631_v49 = vpop.f32.mrf.mxu0 }
  0xbf   :  { %v645_v51 = vpop.f32.mrf.mxu1  ;;  %v632_v54 = vadd.f32 %v631_v49, %v618_v52 }
  0xc1   :  { %v646_v59 = vadd.f32 %v645_v51, %v632_v54 }
  0xc6   :  { %v659_v55 = vpop.f32.mrf.mxu2  ;;  %v633_v58 = vpop.f32.mrf.mxu0 }
  0xc7   :  { %v673_v56 = vpop.f32.mrf.mxu3  ;;  %v634_v60 = vadd.f32 %v633_v58, %v620_v57  ;;  %v660_v61 = vadd.f32 %v659_v55, %v646_v59  ;;  %v647_v62 = vpop.f32.mrf.mxu1 }
  0xc9   :  { %v648_v63 = vadd.f32 %v647_v62, %v634_v60  ;;  %v674_v1 = vadd.f32 %v673_v56, %v660_v61 }
  0xcb   :  { %v678_v5 = vmax.f32 %v674_v1, 0.0 }
  0xce   :  { %v661_v0 = vpop.f32.mrf.mxu2 }
  0xcf   :  { %v662_v2 = vadd.f32 %v661_v0, %v648_v63  ;;  %v675_v3 = vpop.f32.mrf.mxu3 }
  0xd1   :  { %v676_v4 = vadd.f32 %v675_v3, %v662_v2 }
  0xd3   :  { %v679_v6 = vmax.f32 %v676_v4, 0.0 }
  0xd5   :  { %v680_v7 = vpack.c.bf16 %v679_v6, %v678_v5 }
  0xd7   :  { %757 = vmatmul.bf16.vlgmr.msra.gmra.mxu0 %v680_v7 }
 0x154   :  { %v758_v12 = vpop.f32.mrf.mxu0 }
 0x155   :  { %v759_v14 = vadd.f32 %v1262_v13, %v758_v12 }
 0x157   :  { %v763_v17 = vmax.f32 %v759_v14, 0.0 }
 0x15c   :  { %v760_v15 = vpop.f32.mrf.mxu0 }
 0x15d   :  { %v761_v16 = vadd.f32 %v1262_v13, %v760_v15 }
 0x15f   :  { %v764_v18 = vmax.f32 %v761_v16, 0.0 }
 0x161   :  { %v765_v19 = vpack.c.bf16 %v764_v18, %v763_v17 }
 0x163   :  { %842 = vmatmul.bf16.vlgmr.msra.gmra.mxu1 %v765_v19 }
 0x1e0   :  { %v843_v20 = vpop.f32.mrf.mxu1 }
 0x1e1   :  { %v844_v23 = vadd.f32 %v1263_v21, %v843_v20 }
 0x1e8   :  { %v845_v22 = vpop.f32.mrf.mxu1 }
 0x1e9   :  { %v846_v24 = vadd.f32 %v1263_v21, %v845_v22 }
 0x1eb   :  { %v1259_v25 = vpack.c.bf16 %v846_v24, %v844_v23 }
 0x1ed   :  { %1260 = vst [vmem:[%s1611_s7] sm:$0xff] %v1259_v25  }

</bundles_post_ra>
